<compile_context>
chip_gen: v5e
topology: v5e:2x2
jax: 0.10.0
libtpu: 0.0.40
codegen_flags: <defaults>
</compile_context>

<pallas_src>
import jax
import jax.numpy as jnp
from jax.experimental import pallas as pl
from jax.experimental.pallas import tpu as pltpu


# ---------------- kernels ----------------

def _copy_tile_kernel(x_ref, o_ref):
    # Both refs are identical (1, TC, TL) tiles; plain lane-dense copy.
    o_ref[...] = x_ref[...]


def _chomp_slab_kernel(x_ref, o_ref):
    # x_ref: (1, TC, L) slab, o_ref: (1, TC, L_out); small-L fallback.
    L_out = o_ref.shape[2]
    o_ref[...] = x_ref[:, :, :L_out]


# ---------------- wrapper ----------------

def chomp1d(x: jax.Array, chomp_size: int) -> jax.Array:
    """Equivalent of PyTorch Chomp1d(chomp_size).forward(x) for x of shape (N, C, L)."""
    N, C, L = x.shape
    if chomp_size == 0:
        # Treated as a no-op (Chomp1d is always constructed with padding > 0).
        return x
    assert 0 < chomp_size < L, "chomp_size must be in (0, L)"
    L_out = L - chomp_size

    if L_out >= 128:
        # ---- Tiled path: only ever touch the leading L_out time steps. ----
        # Length tile: multiple of 128 lanes -> unmasked vst on full tiles.
        TL = min(1024, (L_out // 128) * 128)
        # Channel tile: whole C when small (full-extent dim is always legal),
        # otherwise 512 rows (multiple of 8/16/32 sublanes for any dtype).
        TC = C if C <= 512 else 512
        grid = (N, pl.cdiv(C, TC), pl.cdiv(L_out, TL))
        return pl.pallas_call(
            _copy_tile_kernel,
            out_shape=jax.ShapeDtypeStruct((N, C, L_out), x.dtype),
            grid_spec=pltpu.PrefetchScalarGridSpec(
                num_scalar_prefetch=0,
                grid=grid,
                in_specs=[pl.BlockSpec((1, TC, TL), lambda n, c, l: (n, c, l))],
                out_specs=pl.BlockSpec((1, TC, TL), lambda n, c, l: (n, c, l)),
            ),
            compiler_params=pltpu.CompilerParams(
                dimension_semantics=("parallel", "parallel", "parallel"),
            ),
        )(x)

    # ---- Small path (L_out < 128): full-extent length blocks, channel-tiled. ----
    TC = C if C <= 1024 else 1024  # 1024 is a multiple of 8/16/32 sublanes
    grid = (N, pl.cdiv(C, TC))
    return pl.pallas_call(
        _chomp_slab_kernel,
        out_shape=jax.ShapeDtypeStruct((N, C, L_out), x.dtype),
        grid_spec=pltpu.PrefetchScalarGridSpec(
            num_scalar_prefetch=0,
            grid=grid,
            in_specs=[pl.BlockSpec((1, TC, L), lambda n, c: (n, c, 0))],
            out_specs=pl.BlockSpec((1, TC, L_out), lambda n, c: (n, c, 0)),
        ),
        compiler_params=pltpu.CompilerParams(
            dimension_semantics=("parallel", "parallel"),
        ),
    )(x)


if __name__ == "__main__":
    key = jax.random.PRNGKey(0)

    # Primary small example matching the PyTorch module layout (N, C, L).
    N, C, L = 2, 4, 16
    chomp_size = 4
    x = jax.random.normal(key, (N, C, L), dtype=jnp.float32)

    out = chomp1d(x, chomp_size)
    jax.block_until_ready(out)

    ref = x[:, :, :-chomp_size]
    assert out.shape == (N, C, L - chomp_size), out.shape
    assert jnp.array_equal(out, ref), "mismatch vs reference slice (small path)"

    # Exercise the tiled path (L_out >= 128): exact tile and partial edge tile.
    k1, k2 = jax.random.split(key)
    x2 = jax.random.normal(k1, (2, 8, 144), dtype=jnp.float32)   # L_out = 128 (exact tile)
    out2 = chomp1d(x2, 16)
    jax.block_until_ready(out2)
    assert jnp.array_equal(out2, x2[:, :, :-16]), "mismatch vs reference (tiled, exact)"

    x3 = jax.random.normal(k2, (1, 12, 300), dtype=jnp.float32)  # L_out = 290 (partial tile)
    out3 = chomp1d(x3, 10)
    jax.block_until_ready(out3)
    assert jnp.array_equal(out3, x3[:, :, :-10]), "mismatch vs reference (tiled, partial)"

    print("KERNEL_OK")
</pallas_src>

<mosaic_0001>
module attributes {stable_mosaic.version = 11 : i64} {
  func.func @_chomp_slab_kernel(%arg0: i32, %arg1: i32, %arg2: memref<1x4x16xf32, #tpu.memory_space<vmem>>, %arg3: memref<1x4x12xf32, #tpu.memory_space<vmem>>) attributes {dimension_semantics = [#tpu.dimension_semantics<parallel>, #tpu.dimension_semantics<parallel>], iteration_bounds = array<i64: 2, 1>, scalar_prefetch = 0 : i64, scratch_operands = 0 : i64, tpu.core_type = #tpu.core_type<tc>, window_params = [{transform_indices = @transform_0, window_bounds = array<i64: 1, 4, 16>}, {transform_indices = @transform_1, window_bounds = array<i64: 1, 4, 12>}]} {
    %c0 = arith.constant 0 : index
    %c0_0 = arith.constant 0 : index
    %c0_1 = arith.constant 0 : index
    %0 = vector.load %arg2[%c0, %c0_0, %c0_1] : memref<1x4x16xf32, #tpu.memory_space<vmem>>, vector<1x4x12xf32>
    %c0_2 = arith.constant 0 : index
    %c0_3 = arith.constant 0 : index
    %c0_4 = arith.constant 0 : index
    %1 = vector.load %arg3[%c0_2, %c0_3, %c0_4] : memref<1x4x12xf32, #tpu.memory_space<vmem>>, vector<1x4x12xf32>
    tpu.vector_store %arg3[%c0_2, %c0_3, %c0_4], %0 {strides = array<i32>} : memref<1x4x12xf32, #tpu.memory_space<vmem>>, vector<1x4x12xf32>,
    return
  }
  func.func @transform_0(%arg0: i32, %arg1: i32) -> (i32, i32, i32) {
    %c0_i32 = arith.constant 0 : i32
    %c0_i32_0 = arith.constant 0 : i32
    return %arg0, %arg1, %c0_i32 : i32, i32, i32
  }
  func.func @transform_1(%arg0: i32, %arg1: i32) -> (i32, i32, i32) {
    %c0_i32 = arith.constant 0 : i32
    %c0_i32_0 = arith.constant 0 : i32
    return %arg0, %arg1, %c0_i32 : i32, i32, i32
  }
}

</mosaic_0001>

<bundles_post_ra>
// kernel: tpu_custom_call.1
= control target key start
LH: loop header
LB: loop body
LE: loop exit
PB: predicated region body
PF: predicated region fallthrough
CT: control target
= control target key end

     0   :  { %6 = vsyncpa [#allocation3], 0  ;;  %s570_s0 = inlined_call_operand.hbm [shape: f32[2,4,16], index: 0, kind: input, shape index: {}]   ;;  %s571_s1 = inlined_call_operand.hbm [shape: f32[2,4,12], index: 1, kind: output, shape index: {}]  }
   0x1   :  { %8 = vsyncpa [#allocation3 + $0x1], 0 }
   0x2   :  { %9 = vsyncpa [#allocation4], 0 }
   0x3   :  { %11 = vsyncpa [#allocation4 + $0x1], 0  ;;  %s450_s6 = smov 0   ;;  %s452_s7 = smov 0  }
   0x4   :  { %s454_s8 = smov 0   ;;  %s456_s9 = smov 0  }
   0x5   :  { %s458_s10 = smov 0   ;;  %s460_s11 = smov 0  }
   0x6 LB: > { %s251_s12 = sadd.s32 4294967295, %s438_s11   ;;  %s252_s13 = sadd.s32 4294967294, %s438_s11   ;;  %s438_s11 = sphi %s460_s11, %s17_s11   ;;  %s434_s10 = sphi %s458_s10, %s580_s10   ;;  %s430_s9 = sphi %s456_s9, %s579_s9   ;;  %s426_s8 = sphi %s454_s8, %s578_s8   ;;  %s422_s7 = sphi %s452_s7, %s577_s7   ;;  %s418_s6 = sphi %s450_s6, %s576_s6  }
   0x7   : > { %s29_s14 = sadd.s32 1, %s434_s10  ;;  %s38_s15 = sadd.s32 1, %s426_s8 }
   0x8   : > { %p31_p0 = scmp.ge.s32.totalorder %s29_s14, 2  ;;  %p45_p1 = scmp.ne.s32.totalorder %s426_s8, %s422_s7 }
   0x9   : > { %p46_p2 = scmp.eq.s32.totalorder %s438_s11, 0  ;;  %p51_p3 = scmp.ne.s32.totalorder %s422_s7, %s418_s6 }
   0xa   : > { %s582_s14 = smov (%p31_p0, %s29_s14), 0  ;;  %p52_p5 = scmp.eq.s32.totalorder %s251_s12, 0 }
   0xb   : > { %p491_p4 = por %p46_p2, %p45_p1  ;;  %s33_s17 = ssub.s32 %s434_s10, %s582_s14 }
   0xc   : > { %p77_p6 = scmp.eq.s32.totalorder %s251_s12, 1  ;;  %p36_p7 = scmp.eq.s32.totalorder %s33_s17, 0 }
   0xd   : > { %p497_p8 = por %p52_p5, %p51_p3  ;;  %p83_p10 = scmp.eq.s32.totalorder %s252_s13, 1 }
   0xe   : > { %p501_p9 = por %p77_p6, %p45_p1  ;;  %p254_p12 = scmp.ge.s32.totalorder %s438_s11, 2 }
   0xf   : > { %s506_s20 = scalar_select %p36_p7, %s426_s8, %s38_s15  }
  0x10   : > { %p508_p11 = por %p83_p10, %p51_p3  ;;  %p276_p13 = scmp.lt.s32.totalorder %s438_s11, 2 }
  0x11   : > { %s103_s22 = sand.u32 1, %s426_s8   ;;  %s256_s24 = sshll.u32 %s434_s10, 2 }
  0x12   : > { %s255_s23 = sshll.u32 %s103_s22, 2  ;;  %s112_s27 = scalar_lea.hbm %s570_s0, %s256_s24 }
  0x13   : > { %s107_s28 = scalar_lea.vmem [#allocation2], %s255_s23  ;;  %s114_s30 = sshll.u32 %s112_s27, 4  ;;  %s115_s30 = int_to_ptr.hbm [resolvable:$true] %s114_s30 }
  0x14   : > { %s116_s29 = sshll.u32 %s107_s28, 4  ;;  %p269_p0 = pnand %p276_p13, %p491_p4  ;;  %s117_s29 = int_to_ptr.vmem [resolvable:$true] %s116_s29 }
  0x15   : > { %p257_p1 = scmp.ge.s32.totalorder %s438_s11, 1  ;;  %p121_p2 = scmp.lt.s32.totalorder %s438_s11, 3 }
  0x16   : > { %s104_s2 = scalar_lea.sflag [#allocation3], %s103_s22 }
  0x17   : > { %271 = dma.hbm_to_vmem [thread:$0]  (!%p269_p0), %s115_s30, 64, %s117_s29, %s104_s2  }
  0x18   : > { %p122_p3 = pnand %p257_p1, %p121_p2 }
  0x19   : > { %s524_s3 = sand.u32 (!%p122_p3), 1, %s422_s7  }
  0x1a   : > { %125 = sbr.rel (%p122_p3) target bundleno = 47 (0x2f), region = 24  ;;  %s258_s4 = sshll.u32 (!%p122_p3), %s524_s3, 2 }
  0x1b   : > { %s128_s5 = scalar_lea.sflag (!%p122_p3), [#allocation3], %s524_s3  ;;  %s131_s12 = scalar_lea.vmem (!%p122_p3), [#allocation2], %s258_s4 }
  0x1f   : > { %409 = dma.done.wait (%p497_p8), %s128_s5, 64  }
  0x20   : > { %411 = vsyncadd (%p497_p8), %s128_s5, 4294967232  ;;  %s261_s13 = sshll.u32 %s430_s9, 2  ;;  %s150_s22 = scalar_lea.vmem [#allocation5], %s258_s4  ;;  %vm152_vm0 = vcmask 93184   ;;  %v151_v0 = vld [vmem:[%s131_s12] sm:$0xf] }
  0x21   : > { %s166_s17 = scalar_lea.hbm %s571_s1, %s261_s13  ;;  %s168_s23 = sshll.u32 %s150_s22, 4  ;;  %153 = vst.msk [vmem:[%s150_s22] sm:$0xf] %vm152_vm0, %v151_v0  ;;  %s169_s23 = int_to_ptr.vmem [resolvable:$true] %s168_s23 }
  0x22   : > { %s170_s24 = sshll.u32 %s166_s17, 4  ;;  %s155_s25 = scalar_lea.sflag [#allocation4], %s524_s3  ;;  %s171_s24 = int_to_ptr.hbm [resolvable:$true] %s170_s24 }
  0x23   : > { %s370_s26 = sshra.s32 %s171_s24, 4  ;;  %s376_s28 = scalar_lea.hbm %s571_s1, 8  ;;  %s371_s26 = int_to_ptr.hbm [resolvable:$true] %s370_s26 }
  0x24   : > { %s372_s18 = scalar_lea.hbm %s371_s26, 4  ;;  %p377_p7 = scmp.lt.s32.totalorder %s371_s26, %s571_s1 }
  0x25   : > { %p373_p4 = scmp.ne.s32.totalorder %s371_s26, %s372_s18  ;;  %p378_p8 = scmp.lt.s32.totalorder %s376_s28, %s372_s18 }
  0x27   : > { %p374_p5 = pnand %p373_p4, %p501_p9  ;;  %p379_p10 = por %p378_p8, %p377_p7 }
  0x29   : > { %p375_p6 = pneg %p374_p5 }
  0x2b   : > { %p380_p13 = pnand %p379_p10, %p375_p6 }
  0x2d   : > { %383 = shalt.err (!%p380_p13)
}
  0x2e   : > { %266 = dma.vmem_to_hbm [thread:$0]  (%p501_p9), %s169_s23, 64, %s171_s24, %s155_s25  }
  0x2f PF: > { %s182_s2 = sand.u32 1, %s418_s6   ;;  %p273_p0 = pnand %p254_p12, %p508_p11 }
  0x30   : > { %s183_s3 = scalar_lea.sflag [#allocation4], %s182_s2 }
  0x31   : > { %p274_p1 = pneg %p273_p0 }
  0x33   : > { %413 = dma.done.wait (%p274_p1), %s183_s3, 64  }
  0x34   : > { %415 = vsyncadd (%p274_p1), %s183_s3, 4294967232  ;;  %s17_s11 = sadd.s32 1, %s438_s11   ;;  %s576_s6 = smov %s422_s7 }
  0x35   : > { %p14_p2 = scmp.ge.s32.totalorder %s17_s11, 4   ;;  %s577_s7 = smov %s426_s8 }
  0x36   : > { %s578_s8 = smov %s506_s20  ;;  %s579_s9 = smov %s434_s10 }
  0x37   : > { %s580_s10 = smov %s582_s14  ;;  %16 = sbr.rel (!%p14_p2) target bundleno = 6 (0x6), region = 69 }
  0x3c   :  { %189 = vsyncpa [#allocation3], 1 }
  0x3d   :  { %191 = vsyncpa [#allocation3 + $0x1], 1 }
  0x3e   :  { %192 = vsyncpa [#allocation4], 1 }
  0x3f   :  { %194 = vsyncpa [#allocation4 + $0x1], 1 }

</bundles_post_ra>
